<compile_context>
chip_gen: v7x
topology: tpu7x:2x2x1
jax: 0.10.0
libtpu: 0.0.40
codegen_flags: <defaults>
</compile_context>

<pallas_src>
import functools
import math

import jax
import jax.numpy as jnp
from jax.experimental import pallas as pl
from jax.experimental.pallas import tpu as pltpu


# ----------------------------------------------------------------------------
# Parameter setup (glue, plain JAX): the sinusoidal positional table.
# ----------------------------------------------------------------------------
def make_positional_encoding(d_model: int, max_len: int = 250) -> jnp.ndarray:
    position = jnp.arange(0, max_len, dtype=jnp.float32)[:, None]          # (L, 1)
    div_term = jnp.exp(
        jnp.arange(0, d_model, 2, dtype=jnp.float32)
        * (-(math.log(10000.0) / d_model))
    )                                                                        # (ceil(D/2),)
    angles = position * div_term                                             # (L, ceil(D/2))
    pe = jnp.zeros((max_len, d_model), dtype=jnp.float32)
    pe = pe.at[:, 0::2].set(jnp.sin(angles)[:, : pe[:, 0::2].shape[1]])
    pe = pe.at[:, 1::2].set(jnp.cos(angles)[:, : pe[:, 1::2].shape[1]])
    return pe


# ----------------------------------------------------------------------------
# Pallas kernels
# ----------------------------------------------------------------------------
def _pe_add_kernel(src_ref, pe_ref, out_ref):
    # src_ref: (TB, ...) block; pe_ref: (1, ...) block broadcast over rows.
    out_ref[...] = src_ref[...] + pe_ref[...]


def _pe_add_dropout_kernel(src_ref, pe_ref, bits_ref, out_ref, *,
                           threshold: int, inv_keep: float):
    # Inverted dropout: drop iff bits < threshold (threshold = p * 2^32),
    # keep -> scale by 1/(1-p).  Single uint compare + select + one multiply.
    y = src_ref[...] + pe_ref[...]
    keep = bits_ref[...] >= jnp.uint32(threshold)
    out_ref[...] = jnp.where(keep, y * jnp.float32(inv_keep), jnp.float32(0.0))


# ----------------------------------------------------------------------------
# Wrapper
# ----------------------------------------------------------------------------
def _pick_row_tile(num_rows: int, row_bytes: int, target_bytes: int = 2 << 20) -> int:
    """Rows per grid step: as many as fit ~target_bytes per buffer, sublane-aligned."""
    tb = max(1, target_bytes // max(1, row_bytes))
    if tb >= num_rows:
        return num_rows
    return min(num_rows, max(8, (tb // 8) * 8))


def positional_encoding_forward(
    src: jnp.ndarray,
    pe_table: jnp.ndarray,
    *,
    dropout_p: float = 0.1,
    training: bool = False,
    rng_key=None,
) -> jnp.ndarray:
    """src: (B, S, D) float32. Returns (B, S, D) float32."""
    B, S, D = src.shape
    pe = pe_table[:S, :]  # (S, D), like pe[:, :src.size(1)]

    lane_dense = (S * D) % 128 == 0
    if lane_dense:
        # Lane-dense 2D layout: last dim is a multiple of 128 -> full-width stores.
        x = src.reshape(B, S * D)
        p = pe.reshape(1, S * D)
        row_bytes = S * D * 4
    else:
        # Fallback: keep (B, S, D), still tile multiple batch rows per step.
        x = src
        p = pe[None, :, :]
        row_bytes = S * D * 4

    ndim = x.ndim
    TB = _pick_row_tile(B, row_bytes)
    grid = (pl.cdiv(B, TB),)

    x_spec = pl.BlockSpec((TB,) + x.shape[1:], lambda b: (b,) + (0,) * (ndim - 1))
    pe_spec = pl.BlockSpec((1,) + x.shape[1:], lambda b: (0,) * ndim)
    out_shape = jax.ShapeDtypeStruct(x.shape, x.dtype)
    cparams = pltpu.CompilerParams(dimension_semantics=("parallel",))

    if (not training) or dropout_p == 0.0:
        out = pl.pallas_call(
            _pe_add_kernel,
            out_shape=out_shape,
            grid=grid,
            in_specs=[x_spec, pe_spec],
            out_specs=x_spec,
            compiler_params=cparams,
        )(x, p)
        return out.reshape(B, S, D)

    if rng_key is None:
        rng_key = jax.random.PRNGKey(0)
    # Random bits generated in plain JAX (portable: real TPU and interpret mode).
    bits = jax.random.bits(rng_key, x.shape, dtype=jnp.uint32)
    threshold = min(int(round(dropout_p * float(2 ** 32))), 2 ** 32 - 1)
    kernel = functools.partial(
        _pe_add_dropout_kernel,
        threshold=threshold,
        inv_keep=1.0 / (1.0 - dropout_p),
    )
    out = pl.pallas_call(
        kernel,
        out_shape=out_shape,
        grid=grid,
        in_specs=[x_spec, pe_spec, x_spec],
        out_specs=x_spec,
        compiler_params=cparams,
    )(x, p, bits)
    return out.reshape(B, S, D)


# ----------------------------------------------------------------------------
# Main
# ----------------------------------------------------------------------------
if __name__ == "__main__":
    key = jax.random.PRNGKey(0)
    k_src, k_drop = jax.random.split(key)

    B, S, D = 2, 8, 32          # batch, seq_len (<= max_len), d_model
    MAX_LEN = 250

    src = jax.random.normal(k_src, (B, S, D), dtype=jnp.float32)
    pe_table = make_positional_encoding(D, MAX_LEN)

    # Eval-mode forward (dropout is identity, matching nn.Dropout.eval()).
    out = positional_encoding_forward(src, pe_table, dropout_p=0.1, training=False)
    out = jax.block_until_ready(out)
    ref = src + pe_table[None, :S, :]
    assert out.shape == (B, S, D)
    assert jnp.allclose(out, ref, atol=1e-6, rtol=1e-6), "eval mismatch vs reference"

    # Training-mode forward (inverted dropout with p=0.1).
    p_drop = 0.1
    out_train = positional_encoding_forward(
        src, pe_table, dropout_p=p_drop, training=True, rng_key=k_drop
    )
    out_train = jax.block_until_ready(out_train)
    assert out_train.shape == (B, S, D)
    scaled = ref / (1.0 - p_drop)
    ok = jnp.logical_or(
        jnp.isclose(out_train, scaled, atol=1e-5, rtol=1e-5),
        out_train == 0.0,
    )
    assert bool(jnp.all(ok)), "training output is neither scaled-kept nor dropped"

    # Non-lane-dense fallback path (S*D not a multiple of 128).
    S2, D2 = 5, 24
    src2 = jax.random.normal(k_src, (B, S2, D2), dtype=jnp.float32)
    pe2 = make_positional_encoding(D2, MAX_LEN)
    out2 = jax.block_until_ready(
        positional_encoding_forward(src2, pe2, dropout_p=0.1, training=False)
    )
    ref2 = src2 + pe2[None, :S2, :]
    assert jnp.allclose(out2, ref2, atol=1e-6, rtol=1e-6), "fallback mismatch"

    print("KERNEL_OK")
</pallas_src>

<mosaic_0001>
module attributes {stable_mosaic.version = 11 : i64} {
  func.func @_pe_add_kernel(%arg0: i32, %arg1: memref<2x256xf32, #tpu.memory_space<vmem>>, %arg2: memref<1x256xf32, #tpu.memory_space<vmem>>, %arg3: memref<2x256xf32, #tpu.memory_space<vmem>>) attributes {dimension_semantics = [#tpu.dimension_semantics<parallel>], iteration_bounds = array<i64: 1>, scalar_prefetch = 0 : i64, scratch_operands = 0 : i64, tpu.core_type = #tpu.core_type<tc>, window_params = [{transform_indices = @transform_0, window_bounds = array<i64: 2, 256>}, {pipeline_mode = #tpu.pipeline_mode<synchronous>, transform_indices = @transform_1, window_bounds = array<i64: 1, 256>}, {transform_indices = @transform_2, window_bounds = array<i64: 2, 256>}]} {
    %c0 = arith.constant 0 : index
    %c0_0 = arith.constant 0 : index
    %0 = vector.load %arg1[%c0, %c0_0] : memref<2x256xf32, #tpu.memory_space<vmem>>, vector<2x256xf32>
    %c0_1 = arith.constant 0 : index
    %c0_2 = arith.constant 0 : index
    %1 = vector.load %arg2[%c0_1, %c0_2] : memref<1x256xf32, #tpu.memory_space<vmem>>, vector<1x256xf32>
    %2 = vector.broadcast %1 : vector<1x256xf32> to vector<2x256xf32>
    %3 = arith.addf %0, %2 : vector<2x256xf32>
    %c0_3 = arith.constant 0 : index
    %c0_4 = arith.constant 0 : index
    %4 = vector.load %arg3[%c0_3, %c0_4] : memref<2x256xf32, #tpu.memory_space<vmem>>, vector<2x256xf32>
    tpu.vector_store %arg3[%c0_3, %c0_4], %3 {strides = array<i32>} : memref<2x256xf32, #tpu.memory_space<vmem>>, vector<2x256xf32>,
    return
  }
  func.func @transform_0(%arg0: i32) -> (i32, i32) {
    %c0_i32 = arith.constant 0 : i32
    %c0_i32_0 = arith.constant 0 : i32
    return %arg0, %c0_i32 : i32, i32
  }
  func.func @transform_1(%arg0: i32) -> (i32, i32) {
    %c0_i32 = arith.constant 0 : i32
    %c0_i32_0 = arith.constant 0 : i32
    %c0_i32_1 = arith.constant 0 : i32
    return %c0_i32, %c0_i32_0 : i32, i32
  }
  func.func @transform_2(%arg0: i32) -> (i32, i32) {
    %c0_i32 = arith.constant 0 : i32
    %c0_i32_0 = arith.constant 0 : i32
    return %arg0, %c0_i32 : i32, i32
  }
}

</mosaic_0001>

<bundles_post_ra>
// kernel: tpu_custom_call.1
= control target key start
LH: loop header
LB: loop body
LE: loop exit
PB: predicated region body
PF: predicated region fallthrough
CT: control target
= control target key end

     0   :  { %7 = vsyncpa [#allocation3], 0  ;;  %s157_s0 = inlined_call_operand.hbm [shape: f32[2,256], index: 0, kind: input, shape index: {}]   ;;  %s158_s1 = inlined_call_operand.vmem [shape: f32[1,256], index: 1, kind: input, shape index: {}]   ;;  %s159_s2 = inlined_call_operand.hbm [shape: f32[2,256], index: 2, kind: output, shape index: {}]  }
   0x1   :  { %8 = vsyncpa [#allocation4], 0  ;;  %s112_s9 = smov [#allocation2]   ;;  %s64_s13 = scalar_lea.hbm %s157_s0, 64 }
   0x2   :  { %s15_s10 = sshll.u32 %s112_s9, 4  ;;  %p65_p0 = scmp.ne.s32.totalorder %s157_s0, %s64_s13  ;;  %s16_s10 = int_to_ptr.vmem [resolvable:$true] %s15_s10 }
   0x3   :  { %p68_p1 = scmp.lt.u32.totalorder %s64_s13, %s157_s0 }
   0x5   :  { %p70_p2 = pnand %p68_p1, %p65_p0 }
   0x7   :  { %73 = shalt.err (!%p70_p2)
}
   0x8   :  { %s74_s18 = scalar_lea.vmem %s16_s10, 64  ;;  %p79_p4 = scmp.lt.s32.totalorder %s16_s10, %s16_s10 }
   0x9   :  { %p75_p3 = scmp.ne.s32.totalorder %s16_s10, %s74_s18  ;;  %p80_p5 = scmp.lt.s32.totalorder %s74_s18, %s74_s18 }
   0xb   :  { %p81_p6 = por %p80_p5, %p79_p4 }
   0xd   :  { %p82_p7 = pnand %p81_p6, %p75_p3 }
   0xf   :  { %85 = shalt.err (!%p82_p7)
}
  0x10   :  { %18 = dma.hbm_to_vmem [thread:$0]  %s157_s0, 64, %s16_s10, [#allocation3]  }
  0x11   :  { %108 = dma.done.wait [#allocation3], 64  }
  0x12   :  { %109 = vsyncadd [#allocation3], 4294967232  ;;  %v27_v0 = vlaneseq  ;;  %v113_v1 = vmov 1983009808   ;;  %v25_v7 = vld [vmem:[%s158_s1] sm:$0x3] }
  0x13   :  { %v37_v2 = vunpack.c.l.s4 %v113_v1  ;;  %v24_v12 = vld [vmem:[#allocation2] sm:$0xf]  ;;  %s114_s23 = smov [#allocation5]  }
  0x14   :  { %v28_v3 = vshrl.u32 %v27_v0, 7  ;;  %s52_s0 = sshll.u32 %s114_s23, 4  ;;  %s53_s0 = int_to_ptr.vmem [resolvable:$true] %s52_s0 }
  0x15   :  { %v38_v6 = vunpack.c.0.s8 %v37_v2  ;;  %s86_s24 = scalar_lea.vmem %s53_s0, 64  ;;  %p91_p9 = scmp.lt.s32.totalorder %s53_s0, %s53_s0 }
  0x16   :  { %v29_v4 = vsub.s32 0, %v28_v3  ;;  %v33_v5 = vsub.s32 1, %v28_v3  ;;  %p87_p8 = scmp.ne.s32.totalorder %s53_s0, %s86_s24  ;;  %p92_p10 = scmp.lt.s32.totalorder %s86_s24, %s86_s24 }
  0x17   :  { %v41_v10 = vsub.s32 %v38_v6, %v28_v3 }
  0x18   :  { %v30_v8 = vrot.slane %v25_v7, %v29_v4  ;;  %v34_v9 = vrot.slane %v25_v7, %v33_v5  ;;  %p93_p11 = por %p92_p10, %p91_p9 }
  0x1a   :  { %v35_v11 = vcombine.low %v30_v8, %v34_v9  ;;  %p94_p12 = pnand %p93_p11, %p87_p8 }
  0x1c   :  { %v42_v13 = vrot.slane %v35_v11, %v41_v10 }
  0x1e   :  { %v44_v14 = vadd.f32 %v42_v13, %v24_v12 }
  0x20   :  { %45 = vst [vmem:[#allocation5] sm:$0xf] %v44_v14 }
  0x21   :  { %97 = shalt.err (!%p94_p12)
}
  0x22   :  { %s98_s26 = scalar_lea.hbm %s159_s2, 64 }
  0x23   :  { %p99_p13 = scmp.ne.s32.totalorder %s159_s2, %s98_s26  ;;  %p102_p0 = scmp.lt.u32.totalorder %s98_s26, %s159_s2 }
  0x25   :  { %p104_p1 = pnand %p102_p0, %p99_p13 }
  0x27   :  { %107 = shalt.err (!%p104_p1)
}
  0x28   :  { %55 = dma.vmem_to_hbm [thread:$0]  %s53_s0, 64, %s159_s2, [#allocation4]  }
  0x29   :  { %110 = dma.done.wait [#allocation4], 64  }
  0x2a   :  { %111 = vsyncadd [#allocation4], 4294967232 }
  0x2b   :  { %59 = vsyncpa [#allocation3], 1 }
  0x2c   :  { %60 = vsyncpa [#allocation4], 1 }

</bundles_post_ra>
